<compile_context>
chip_gen: v6e
topology: v6e:2x2x1
jax: 0.10.0
libtpu: 0.0.40
codegen_flags: <defaults>
</compile_context>

<pallas_src>
import jax
import jax.numpy as jnp
import numpy as np
from jax.experimental import pallas as pl
from jax.experimental.pallas import tpu as pltpu

_BN_EPS = 1e-5


# ----------------------------------------------------------------------------
# Fused Pallas kernel: conv1 -> conv2 -> conv3 -> bilinear upsample -> sigmoid gate
# ----------------------------------------------------------------------------
def ge_fused_kernel(x_ref,
                    a1_ref, m1_ref, b1_ref,
                    a2_ref, m2_ref, b2_ref,
                    a3_ref, m3_ref, b3_ref,
                    wh_ref, bcol_ref,
                    o_ref):
    """All operands are lane-dense 2-D tiles (rows, W*C).

    x_ref:  (1, H, W*C)          input image (also the residual)
    aK_ref: (3, HoK, HinK)       row-select matrices (pad + stride-2 folded in)
    mK_ref: (3, WinK*Cin, WoK*C) depthwise*pointwise*BN-scale column matrices
    bK_ref: (1, WoK*C)           folded BN bias (tiled over Wo)
    wh_ref: (28, h3)             bilinear row-interpolation matrix
    bcol_ref: (w3*C, 28*C)       bilinear column-interpolation (block-diag)
    o_ref:  (1, 28, 28*C)
    """
    x = x_ref[0].astype(jnp.float32)                       # (H, W*C)

    def dwconv(y, a_ref, m_ref, b_ref):
        acc = None
        for kh in range(3):                                # static 3-tap unroll
            t = jnp.dot(a_ref[kh].astype(jnp.float32), y,
                        preferred_element_type=jnp.float32)
            t = jnp.dot(t, m_ref[kh].astype(jnp.float32),
                        preferred_element_type=jnp.float32)
            acc = t if acc is None else acc + t
        return jnp.maximum(acc + b_ref[...].astype(jnp.float32), 0.0)

    y = dwconv(x, a1_ref, m1_ref, b1_ref)                  # (14, 14*C)
    y = dwconv(y, a2_ref, m2_ref, b2_ref)                  # (7,  7*C)
    y = dwconv(y, a3_ref, m3_ref, b3_ref)                  # (4,  4*C)

    t = jnp.dot(wh_ref[...].astype(jnp.float32), y,
                preferred_element_type=jnp.float32)        # (28, 4*C)
    up = jnp.dot(t, bcol_ref[...].astype(jnp.float32),
                 preferred_element_type=jnp.float32)       # (28, 28*C)

    out = x * (1.0 + jax.nn.sigmoid(up))                   # residual*gate + residual
    o_ref[...] = out.astype(o_ref.dtype).reshape(o_ref.shape)


# ----------------------------------------------------------------------------
# Wrapper-side parameter folding (pure glue, runs once per call in XLA)
# ----------------------------------------------------------------------------
def _fold_bn(gamma, beta, mean, var, eps=_BN_EPS):
    scale = gamma / jnp.sqrt(var + eps)
    bias = beta - mean * scale
    return scale, bias


def _row_select(h, ho):
    """A[kh][i, r] = 1 iff r == 2*i + kh - 1 (zero-pad rows become zero rows)."""
    a = np.zeros((3, ho, h), np.float32)
    for kh in range(3):
        for i in range(ho):
            r = 2 * i + kh - 1
            if 0 <= r < h:
                a[kh, i, r] = 1.0
    return a


def _col_select(w, wo):
    """S[kw][x, j] = 1 iff x == 2*j + kw - 1."""
    s = np.zeros((3, w, wo), np.float32)
    for kw in range(3):
        for j in range(wo):
            xw = 2 * j + kw - 1
            if 0 <= xw < w:
                s[kw, xw, j] = 1.0
    return s


def _build_dwconv_mats(p, h, w):
    """Fold pad=1 / stride=2 / 3x3 depthwise / 1x1 pointwise / eval-BN into
    3 row-select matrices A[kh], 3 column weight matrices M[kh] and a bias row."""
    wdw, wpw = p["dw"], p["pw"]                            # (3,3,Cin), (Cin,Cout)
    cin, cout = wdw.shape[-1], wpw.shape[-1]
    scale, bias = _fold_bn(p["gamma"], p["beta"], p["mean"], p["var"])
    wps = wpw * scale[None, :]                             # BN scale folded into PW
    ho, wo = (h - 1) // 2 + 1, (w - 1) // 2 + 1
    a = jnp.asarray(_row_select(h, ho))                    # (3, Ho, H)
    s = jnp.asarray(_col_select(w, wo))                    # (3, W, Wo)
    # M[kh][x*Cin+ci, j*Cout+co] = sum_kw S[kw,x,j] * wdw[kh,kw,ci] * wps[ci,co]
    m = jnp.einsum("xwj,kxc,cd->kwcjd", s, wdw, wps)
    m = m.reshape(3, w * cin, wo * cout)
    brow = jnp.tile(bias, wo).reshape(1, wo * cout)
    return a, m, brow, (ho, wo, cout)


def bilinear_matrix(in_size, out_size):
    """PyTorch nn.Upsample(mode='bilinear', align_corners=False) weights as a matrix."""
    scale = in_size / out_size
    out_idx = np.arange(out_size)
    src = (out_idx + 0.5) * scale - 0.5
    src = np.clip(src, 0.0, None)
    i0 = np.clip(np.floor(src).astype(np.int64), 0, in_size - 1)
    i1 = np.minimum(i0 + 1, in_size - 1)
    lam = (src - i0).astype(np.float32)
    mat = np.zeros((out_size, in_size), np.float32)
    mat[out_idx, i0] += 1.0 - lam
    mat[out_idx, i1] += lam
    return mat


def ge_module(x_nchw, params):
    """Full GEmodule forward.  Input/output NCHW; spatial must be 28x28 and
    inchannal == outchannal (required by the module's residual multiply)."""
    n, c, h, w = x_nchw.shape
    assert (h, w) == (28, 28), "GEmodule residual requires 28x28 input"
    x2d = jnp.transpose(x_nchw, (0, 2, 3, 1)).reshape(n, h, w * c)  # lane-dense (H, W*C)

    a1, m1, b1, (h1, w1, _) = _build_dwconv_mats(params["conv1"], h, w)
    a2, m2, b2, (h2, w2, _) = _build_dwconv_mats(params["conv2"], h1, w1)
    a3, m3, b3, (h3, w3, c3) = _build_dwconv_mats(params["conv3"], h2, w2)
    assert c3 == c, "residual multiply requires outchannal == inchannal"

    wh = jnp.asarray(bilinear_matrix(h3, 28))                        # (28, h3)
    ww = bilinear_matrix(w3, 28)                                     # (28, w3)
    bcol = jnp.asarray(np.kron(ww.T, np.eye(c, dtype=np.float32)))   # (w3*C, 28*C)

    const = lambda i: (0, 0, 0)
    const2 = lambda i: (0, 0)

    out2d = pl.pallas_call(
        ge_fused_kernel,
        out_shape=jax.ShapeDtypeStruct((n, 28, 28 * c), x_nchw.dtype),
        grid=(n,),
        in_specs=[
            pl.BlockSpec((1, h, w * c), lambda i: (i, 0, 0)),
            pl.BlockSpec(a1.shape, const), pl.BlockSpec(m1.shape, const),
            pl.BlockSpec(b1.shape, const2),
            pl.BlockSpec(a2.shape, const), pl.BlockSpec(m2.shape, const),
            pl.BlockSpec(b2.shape, const2),
            pl.BlockSpec(a3.shape, const), pl.BlockSpec(m3.shape, const),
            pl.BlockSpec(b3.shape, const2),
            pl.BlockSpec(wh.shape, const2), pl.BlockSpec(bcol.shape, const2),
        ],
        out_specs=pl.BlockSpec((1, 28, 28 * c), lambda i: (i, 0, 0)),
        compiler_params=pltpu.CompilerParams(dimension_semantics=("parallel",)),
    )(x2d, a1, m1, b1, a2, m2, b2, a3, m3, b3, wh, bcol)

    out = out2d.reshape(n, 28, 28, c)
    return jnp.transpose(out, (0, 3, 1, 2))                          # NHWC -> NCHW


# ----------------------------------------------------------------------------
# Pure-JAX reference (for validation)
# ----------------------------------------------------------------------------
def _dwconv_ref(x, p):
    cin = x.shape[-1]
    cout = p["pw"].shape[1]
    scale, bias = _fold_bn(p["gamma"], p["beta"], p["mean"], p["var"])
    dwk = p["dw"].reshape(3, 3, 1, cin)
    y = jax.lax.conv_general_dilated(
        x, dwk, (2, 2), ((1, 1), (1, 1)),
        dimension_numbers=("NHWC", "HWIO", "NHWC"), feature_group_count=cin)
    pwk = p["pw"].reshape(1, 1, cin, cout)
    y = jax.lax.conv_general_dilated(
        y, pwk, (1, 1), ((0, 0), (0, 0)),
        dimension_numbers=("NHWC", "HWIO", "NHWC"))
    y = y * scale + bias
    return jnp.maximum(y, 0.0)


def ge_module_ref(x_nchw, params):
    x = jnp.transpose(x_nchw, (0, 2, 3, 1))
    out = _dwconv_ref(x, params["conv1"])
    out = _dwconv_ref(out, params["conv2"])
    out = _dwconv_ref(out, params["conv3"])
    wh = jnp.asarray(bilinear_matrix(out.shape[1], 28))
    ww = jnp.asarray(bilinear_matrix(out.shape[2], 28))
    up = jnp.einsum("hi,niwc->nhwc", wh, out)
    up = jnp.einsum("wj,nhjc->nhwc", ww, up)
    gate = jax.nn.sigmoid(up)
    out = x * gate + x
    return jnp.transpose(out, (0, 3, 1, 2))


# ----------------------------------------------------------------------------
# Main
# ----------------------------------------------------------------------------
def _make_dwconv_params(key, cin, cout):
    k1, k2, k3, k4, k5, k6 = jax.random.split(key, 6)
    return dict(
        dw=0.3 * jax.random.normal(k1, (3, 3, cin), jnp.float32),
        pw=0.3 * jax.random.normal(k2, (cin, cout), jnp.float32),
        gamma=1.0 + 0.1 * jax.random.normal(k3, (cout,), jnp.float32),
        beta=0.1 * jax.random.normal(k4, (cout,), jnp.float32),
        mean=0.1 * jax.random.normal(k5, (cout,), jnp.float32),
        var=1.0 + 0.1 * jax.random.uniform(k6, (cout,), jnp.float32),
    )


if __name__ == "__main__":
    key = jax.random.PRNGKey(0)
    k_x, k1, k2, k3 = jax.random.split(key, 4)

    # Shapes implied by the module: residual multiply requires input spatial == 28x28
    # (the upsample target) and inchannal == outchannal.
    N, C, H, W = 2, 4, 28, 28
    x = jax.random.normal(k_x, (N, C, H, W), jnp.float32)

    params = dict(
        conv1=_make_dwconv_params(k1, C, C),
        conv2=_make_dwconv_params(k2, C, C),
        conv3=_make_dwconv_params(k3, C, C),
    )

    out = jax.block_until_ready(ge_module(x, params))
    ref = jax.block_until_ready(ge_module_ref(x, params))

    assert out.shape == (N, C, 28, 28), out.shape
    np.testing.assert_allclose(np.asarray(out), np.asarray(ref), rtol=2e-4, atol=2e-4)

    print("KERNEL_OK")
</pallas_src>

<mosaic_0001>
module attributes {stable_mosaic.version = 11 : i64} {
  func.func @ge_fused_kernel(%arg0: i32, %arg1: memref<1x28x112xf32, #tpu.memory_space<vmem>>, %arg2: memref<3x14x28xf32, #tpu.memory_space<vmem>>, %arg3: memref<3x112x56xf32, #tpu.memory_space<vmem>>, %arg4: memref<1x56xf32, #tpu.memory_space<vmem>>, %arg5: memref<3x7x14xf32, #tpu.memory_space<vmem>>, %arg6: memref<3x56x28xf32, #tpu.memory_space<vmem>>, %arg7: memref<1x28xf32, #tpu.memory_space<vmem>>, %arg8: memref<3x4x7xf32, #tpu.memory_space<vmem>>, %arg9: memref<3x28x16xf32, #tpu.memory_space<vmem>>, %arg10: memref<1x16xf32, #tpu.memory_space<vmem>>, %arg11: memref<28x4xf32, #tpu.memory_space<vmem>>, %arg12: memref<16x112xf32, #tpu.memory_space<vmem>>, %arg13: memref<1x28x112xf32, #tpu.memory_space<vmem>>) attributes {dimension_semantics = [#tpu.dimension_semantics<parallel>], iteration_bounds = array<i64: 2>, scalar_prefetch = 0 : i64, scratch_operands = 0 : i64, tpu.core_type = #tpu.core_type<tc>, window_params = [{transform_indices = @transform_0, window_bounds = array<i64: 1, 28, 112>}, {pipeline_mode = #tpu.pipeline_mode<synchronous>, transform_indices = @transform_1, window_bounds = array<i64: 3, 14, 28>}, {pipeline_mode = #tpu.pipeline_mode<synchronous>, transform_indices = @transform_2, window_bounds = array<i64: 3, 112, 56>}, {pipeline_mode = #tpu.pipeline_mode<synchronous>, transform_indices = @transform_3, window_bounds = array<i64: 1, 56>}, {pipeline_mode = #tpu.pipeline_mode<synchronous>, transform_indices = @transform_4, window_bounds = array<i64: 3, 7, 14>}, {pipeline_mode = #tpu.pipeline_mode<synchronous>, transform_indices = @transform_5, window_bounds = array<i64: 3, 56, 28>}, {pipeline_mode = #tpu.pipeline_mode<synchronous>, transform_indices = @transform_6, window_bounds = array<i64: 1, 28>}, {pipeline_mode = #tpu.pipeline_mode<synchronous>, transform_indices = @transform_7, window_bounds = array<i64: 3, 4, 7>}, {pipeline_mode = #tpu.pipeline_mode<synchronous>, transform_indices = @transform_8, window_bounds = array<i64: 3, 28, 16>}, {pipeline_mode = #tpu.pipeline_mode<synchronous>, transform_indices = @transform_9, window_bounds = array<i64: 1, 16>}, {pipeline_mode = #tpu.pipeline_mode<synchronous>, transform_indices = @transform_10, window_bounds = array<i64: 28, 4>}, {pipeline_mode = #tpu.pipeline_mode<synchronous>, transform_indices = @transform_11, window_bounds = array<i64: 16, 112>}, {transform_indices = @transform_12, window_bounds = array<i64: 1, 28, 112>}]} {
    %c0 = arith.constant 0 : index
    %c0_0 = arith.constant 0 : index
    %c0_1 = arith.constant 0 : index
    %0 = vector.load %arg1[%c0, %c0_0, %c0_1] : memref<1x28x112xf32, #tpu.memory_space<vmem>>, vector<1x28x112xf32>
    %1 = vector.shape_cast %0 : vector<1x28x112xf32> to vector<28x112xf32>
    %c0_2 = arith.constant 0 : index
    %c0_3 = arith.constant 0 : index
    %c0_4 = arith.constant 0 : index
    %2 = vector.load %arg2[%c0_2, %c0_3, %c0_4] : memref<3x14x28xf32, #tpu.memory_space<vmem>>, vector<1x14x28xf32>
    %3 = vector.shape_cast %2 : vector<1x14x28xf32> to vector<14x28xf32>
    %cst = arith.constant dense<0.000000e+00> : vector<14x112xf32>
    %4 = tpu.matmul %3, %1, %cst {dimension_numbers = #tpu.dot_dimension_numbers<[1], [0], [0], [1], [0, 0, 1, 1], [], []>} : vector<14x28xf32>, vector<28x112xf32>, vector<14x112xf32> -> vector<14x112xf32>
    %c0_5 = arith.constant 0 : index
    %c0_6 = arith.constant 0 : index
    %c0_7 = arith.constant 0 : index
    %5 = vector.load %arg3[%c0_5, %c0_6, %c0_7] : memref<3x112x56xf32, #tpu.memory_space<vmem>>, vector<1x112x56xf32>
    %6 = vector.shape_cast %5 : vector<1x112x56xf32> to vector<112x56xf32>
    %cst_8 = arith.constant dense<0.000000e+00> : vector<14x56xf32>
    %7 = tpu.matmul %4, %6, %cst_8 {dimension_numbers = #tpu.dot_dimension_numbers<[1], [0], [0], [1], [0, 0, 1, 1], [], []>} : vector<14x112xf32>, vector<112x56xf32>, vector<14x56xf32> -> vector<14x56xf32>
    %c1 = arith.constant 1 : index
    %c0_9 = arith.constant 0 : index
    %c0_10 = arith.constant 0 : index
    %8 = vector.load %arg2[%c1, %c0_9, %c0_10] : memref<3x14x28xf32, #tpu.memory_space<vmem>>, vector<1x14x28xf32>
    %9 = vector.shape_cast %8 : vector<1x14x28xf32> to vector<14x28xf32>
    %cst_11 = arith.constant dense<0.000000e+00> : vector<14x112xf32>
    %10 = tpu.matmul %9, %1, %cst_11 {dimension_numbers = #tpu.dot_dimension_numbers<[1], [0], [0], [1], [0, 0, 1, 1], [], []>} : vector<14x28xf32>, vector<28x112xf32>, vector<14x112xf32> -> vector<14x112xf32>
    %c1_12 = arith.constant 1 : index
    %c0_13 = arith.constant 0 : index
    %c0_14 = arith.constant 0 : index
    %11 = vector.load %arg3[%c1_12, %c0_13, %c0_14] : memref<3x112x56xf32, #tpu.memory_space<vmem>>, vector<1x112x56xf32>
    %12 = vector.shape_cast %11 : vector<1x112x56xf32> to vector<112x56xf32>
    %cst_15 = arith.constant dense<0.000000e+00> : vector<14x56xf32>
    %13 = tpu.matmul %10, %12, %cst_15 {dimension_numbers = #tpu.dot_dimension_numbers<[1], [0], [0], [1], [0, 0, 1, 1], [], []>} : vector<14x112xf32>, vector<112x56xf32>, vector<14x56xf32> -> vector<14x56xf32>
    %14 = arith.addf %7, %13 : vector<14x56xf32>
    %c2 = arith.constant 2 : index
    %c0_16 = arith.constant 0 : index
    %c0_17 = arith.constant 0 : index
    %15 = vector.load %arg2[%c2, %c0_16, %c0_17] : memref<3x14x28xf32, #tpu.memory_space<vmem>>, vector<1x14x28xf32>
    %16 = vector.shape_cast %15 : vector<1x14x28xf32> to vector<14x28xf32>
    %cst_18 = arith.constant dense<0.000000e+00> : vector<14x112xf32>
    %17 = tpu.matmul %16, %1, %cst_18 {dimension_numbers = #tpu.dot_dimension_numbers<[1], [0], [0], [1], [0, 0, 1, 1], [], []>} : vector<14x28xf32>, vector<28x112xf32>, vector<14x112xf32> -> vector<14x112xf32>
    %c2_19 = arith.constant 2 : index
    %c0_20 = arith.constant 0 : index
    %c0_21 = arith.constant 0 : index
    %18 = vector.load %arg3[%c2_19, %c0_20, %c0_21] : memref<3x112x56xf32, #tpu.memory_space<vmem>>, vector<1x112x56xf32>
    %19 = vector.shape_cast %18 : vector<1x112x56xf32> to vector<112x56xf32>
    %cst_22 = arith.constant dense<0.000000e+00> : vector<14x56xf32>
    %20 = tpu.matmul %17, %19, %cst_22 {dimension_numbers = #tpu.dot_dimension_numbers<[1], [0], [0], [1], [0, 0, 1, 1], [], []>} : vector<14x112xf32>, vector<112x56xf32>, vector<14x56xf32> -> vector<14x56xf32>
    %21 = arith.addf %14, %20 : vector<14x56xf32>
    %c0_23 = arith.constant 0 : index
    %c0_24 = arith.constant 0 : index
    %22 = vector.load %arg4[%c0_23, %c0_24] : memref<1x56xf32, #tpu.memory_space<vmem>>, vector<1x56xf32>
    %23 = vector.broadcast %22 : vector<1x56xf32> to vector<14x56xf32>
    %24 = arith.addf %21, %23 : vector<14x56xf32>
    %cst_25 = arith.constant 0.000000e+00 : f32
    %25 = vector.broadcast %cst_25 : f32 to vector<14x56xf32>
    %26 = arith.maximumf %24, %25 : vector<14x56xf32>
    %c0_26 = arith.constant 0 : index
    %c0_27 = arith.constant 0 : index
    %c0_28 = arith.constant 0 : index
    %27 = vector.load %arg5[%c0_26, %c0_27, %c0_28] : memref<3x7x14xf32, #tpu.memory_space<vmem>>, vector<1x7x14xf32>
    %28 = vector.shape_cast %27 : vector<1x7x14xf32> to vector<7x14xf32>
    %cst_29 = arith.constant dense<0.000000e+00> : vector<7x56xf32>
    %29 = tpu.matmul %28, %26, %cst_29 {dimension_numbers = #tpu.dot_dimension_numbers<[1], [0], [0], [1], [0, 0, 1, 1], [], []>} : vector<7x14xf32>, vector<14x56xf32>, vector<7x56xf32> -> vector<7x56xf32>
    %c0_30 = arith.constant 0 : index
    %c0_31 = arith.constant 0 : index
    %c0_32 = arith.constant 0 : index
    %30 = vector.load %arg6[%c0_30, %c0_31, %c0_32] : memref<3x56x28xf32, #tpu.memory_space<vmem>>, vector<1x56x28xf32>
    %31 = vector.shape_cast %30 : vector<1x56x28xf32> to vector<56x28xf32>
    %cst_33 = arith.constant dense<0.000000e+00> : vector<7x28xf32>
    %32 = tpu.matmul %29, %31, %cst_33 {dimension_numbers = #tpu.dot_dimension_numbers<[1], [0], [0], [1], [0, 0, 1, 1], [], []>} : vector<7x56xf32>, vector<56x28xf32>, vector<7x28xf32> -> vector<7x28xf32>
    %c1_34 = arith.constant 1 : index
    %c0_35 = arith.constant 0 : index
    %c0_36 = arith.constant 0 : index
    %33 = vector.load %arg5[%c1_34, %c0_35, %c0_36] : memref<3x7x14xf32, #tpu.memory_space<vmem>>, vector<1x7x14xf32>
    %34 = vector.shape_cast %33 : vector<1x7x14xf32> to vector<7x14xf32>
    %cst_37 = arith.constant dense<0.000000e+00> : vector<7x56xf32>
    %35 = tpu.matmul %34, %26, %cst_37 {dimension_numbers = #tpu.dot_dimension_numbers<[1], [0], [0], [1], [0, 0, 1, 1], [], []>} : vector<7x14xf32>, vector<14x56xf32>, vector<7x56xf32> -> vector<7x56xf32>
    %c1_38 = arith.constant 1 : index
    %c0_39 = arith.constant 0 : index
    %c0_40 = arith.constant 0 : index
    %36 = vector.load %arg6[%c1_38, %c0_39, %c0_40] : memref<3x56x28xf32, #tpu.memory_space<vmem>>, vector<1x56x28xf32>
    %37 = vector.shape_cast %36 : vector<1x56x28xf32> to vector<56x28xf32>
    %cst_41 = arith.constant dense<0.000000e+00> : vector<7x28xf32>
    %38 = tpu.matmul %35, %37, %cst_41 {dimension_numbers = #tpu.dot_dimension_numbers<[1], [0], [0], [1], [0, 0, 1, 1], [], []>} : vector<7x56xf32>, vector<56x28xf32>, vector<7x28xf32> -> vector<7x28xf32>
    %39 = arith.addf %32, %38 : vector<7x28xf32>
    %c2_42 = arith.constant 2 : index
    %c0_43 = arith.constant 0 : index
    %c0_44 = arith.constant 0 : index
    %40 = vector.load %arg5[%c2_42, %c0_43, %c0_44] : memref<3x7x14xf32, #tpu.memory_space<vmem>>, vector<1x7x14xf32>
    %41 = vector.shape_cast %40 : vector<1x7x14xf32> to vector<7x14xf32>
    %cst_45 = arith.constant dense<0.000000e+00> : vector<7x56xf32>
    %42 = tpu.matmul %41, %26, %cst_45 {dimension_numbers = #tpu.dot_dimension_numbers<[1], [0], [0], [1], [0, 0, 1, 1], [], []>} : vector<7x14xf32>, vector<14x56xf32>, vector<7x56xf32> -> vector<7x56xf32>
    %c2_46 = arith.constant 2 : index
    %c0_47 = arith.constant 0 : index
    %c0_48 = arith.constant 0 : index
    %43 = vector.load %arg6[%c2_46, %c0_47, %c0_48] : memref<3x56x28xf32, #tpu.memory_space<vmem>>, vector<1x56x28xf32>
    %44 = vector.shape_cast %43 : vector<1x56x28xf32> to vector<56x28xf32>
    %cst_49 = arith.constant dense<0.000000e+00> : vector<7x28xf32>
    %45 = tpu.matmul %42, %44, %cst_49 {dimension_numbers = #tpu.dot_dimension_numbers<[1], [0], [0], [1], [0, 0, 1, 1], [], []>} : vector<7x56xf32>, vector<56x28xf32>, vector<7x28xf32> -> vector<7x28xf32>
    %46 = arith.addf %39, %45 : vector<7x28xf32>
    %c0_50 = arith.constant 0 : index
    %c0_51 = arith.constant 0 : index
    %47 = vector.load %arg7[%c0_50, %c0_51] : memref<1x28xf32, #tpu.memory_space<vmem>>, vector<1x28xf32>
    %48 = vector.broadcast %47 : vector<1x28xf32> to vector<7x28xf32>
    %49 = arith.addf %46, %48 : vector<7x28xf32>
    %cst_52 = arith.constant 0.000000e+00 : f32
    %50 = vector.broadcast %cst_52 : f32 to vector<7x28xf32>
    %51 = arith.maximumf %49, %50 : vector<7x28xf32>
    %c0_53 = arith.constant 0 : index
    %c0_54 = arith.constant 0 : index
    %c0_55 = arith.constant 0 : index
    %52 = vector.load %arg8[%c0_53, %c0_54, %c0_55] : memref<3x4x7xf32, #tpu.memory_space<vmem>>, vector<1x4x7xf32>
    %53 = vector.shape_cast %52 : vector<1x4x7xf32> to vector<4x7xf32>
    %cst_56 = arith.constant dense<0.000000e+00> : vector<4x28xf32>
    %54 = tpu.matmul %53, %51, %cst_56 {dimension_numbers = #tpu.dot_dimension_numbers<[1], [0], [0], [1], [0, 0, 1, 1], [], []>} : vector<4x7xf32>, vector<7x28xf32>, vector<4x28xf32> -> vector<4x28xf32>
    %c0_57 = arith.constant 0 : index
    %c0_58 = arith.constant 0 : index
    %c0_59 = arith.constant 0 : index
    %55 = vector.load %arg9[%c0_57, %c0_58, %c0_59] : memref<3x28x16xf32, #tpu.memory_space<vmem>>, vector<1x28x16xf32>
    %56 = vector.shape_cast %55 : vector<1x28x16xf32> to vector<28x16xf32>
    %cst_60 = arith.constant dense<0.000000e+00> : vector<4x16xf32>
    %57 = tpu.matmul %54, %56, %cst_60 {dimension_numbers = #tpu.dot_dimension_numbers<[1], [0], [0], [1], [0, 0, 1, 1], [], []>} : vector<4x28xf32>, vector<28x16xf32>, vector<4x16xf32> -> vector<4x16xf32>
    %c1_61 = arith.constant 1 : index
    %c0_62 = arith.constant 0 : index
    %c0_63 = arith.constant 0 : index
    %58 = vector.load %arg8[%c1_61, %c0_62, %c0_63] : memref<3x4x7xf32, #tpu.memory_space<vmem>>, vector<1x4x7xf32>
    %59 = vector.shape_cast %58 : vector<1x4x7xf32> to vector<4x7xf32>
    %cst_64 = arith.constant dense<0.000000e+00> : vector<4x28xf32>
    %60 = tpu.matmul %59, %51, %cst_64 {dimension_numbers = #tpu.dot_dimension_numbers<[1], [0], [0], [1], [0, 0, 1, 1], [], []>} : vector<4x7xf32>, vector<7x28xf32>, vector<4x28xf32> -> vector<4x28xf32>
    %c1_65 = arith.constant 1 : index
    %c0_66 = arith.constant 0 : index
    %c0_67 = arith.constant 0 : index
    %61 = vector.load %arg9[%c1_65, %c0_66, %c0_67] : memref<3x28x16xf32, #tpu.memory_space<vmem>>, vector<1x28x16xf32>
    %62 = vector.shape_cast %61 : vector<1x28x16xf32> to vector<28x16xf32>
    %cst_68 = arith.constant dense<0.000000e+00> : vector<4x16xf32>
    %63 = tpu.matmul %60, %62, %cst_68 {dimension_numbers = #tpu.dot_dimension_numbers<[1], [0], [0], [1], [0, 0, 1, 1], [], []>} : vector<4x28xf32>, vector<28x16xf32>, vector<4x16xf32> -> vector<4x16xf32>
    %64 = arith.addf %57, %63 : vector<4x16xf32>
    %c2_69 = arith.constant 2 : index
    %c0_70 = arith.constant 0 : index
    %c0_71 = arith.constant 0 : index
    %65 = vector.load %arg8[%c2_69, %c0_70, %c0_71] : memref<3x4x7xf32, #tpu.memory_space<vmem>>, vector<1x4x7xf32>
    %66 = vector.shape_cast %65 : vector<1x4x7xf32> to vector<4x7xf32>
    %cst_72 = arith.constant dense<0.000000e+00> : vector<4x28xf32>
    %67 = tpu.matmul %66, %51, %cst_72 {dimension_numbers = #tpu.dot_dimension_numbers<[1], [0], [0], [1], [0, 0, 1, 1], [], []>} : vector<4x7xf32>, vector<7x28xf32>, vector<4x28xf32> -> vector<4x28xf32>
    %c2_73 = arith.constant 2 : index
    %c0_74 = arith.constant 0 : index
    %c0_75 = arith.constant 0 : index
    %68 = vector.load %arg9[%c2_73, %c0_74, %c0_75] : memref<3x28x16xf32, #tpu.memory_space<vmem>>, vector<1x28x16xf32>
    %69 = vector.shape_cast %68 : vector<1x28x16xf32> to vector<28x16xf32>
    %cst_76 = arith.constant dense<0.000000e+00> : vector<4x16xf32>
    %70 = tpu.matmul %67, %69, %cst_76 {dimension_numbers = #tpu.dot_dimension_numbers<[1], [0], [0], [1], [0, 0, 1, 1], [], []>} : vector<4x28xf32>, vector<28x16xf32>, vector<4x16xf32> -> vector<4x16xf32>
    %71 = arith.addf %64, %70 : vector<4x16xf32>
    %c0_77 = arith.constant 0 : index
    %c0_78 = arith.constant 0 : index
    %72 = vector.load %arg10[%c0_77, %c0_78] : memref<1x16xf32, #tpu.memory_space<vmem>>, vector<1x16xf32>
    %73 = vector.broadcast %72 : vector<1x16xf32> to vector<4x16xf32>
    %74 = arith.addf %71, %73 : vector<4x16xf32>
    %cst_79 = arith.constant 0.000000e+00 : f32
    %75 = vector.broadcast %cst_79 : f32 to vector<4x16xf32>
    %76 = arith.maximumf %74, %75 : vector<4x16xf32>
    %c0_80 = arith.constant 0 : index
    %c0_81 = arith.constant 0 : index
    %77 = vector.load %arg11[%c0_80, %c0_81] : memref<28x4xf32, #tpu.memory_space<vmem>>, vector<28x4xf32>
    %cst_82 = arith.constant dense<0.000000e+00> : vector<28x16xf32>
    %78 = tpu.matmul %77, %76, %cst_82 {dimension_numbers = #tpu.dot_dimension_numbers<[1], [0], [0], [1], [0, 0, 1, 1], [], []>} : vector<28x4xf32>, vector<4x16xf32>, vector<28x16xf32> -> vector<28x16xf32>
    %c0_83 = arith.constant 0 : index
    %c0_84 = arith.constant 0 : index
    %79 = vector.load %arg12[%c0_83, %c0_84] : memref<16x112xf32, #tpu.memory_space<vmem>>, vector<16x112xf32>
    %cst_85 = arith.constant dense<0.000000e+00> : vector<28x112xf32>
    %80 = tpu.matmul %78, %79, %cst_85 {dimension_numbers = #tpu.dot_dimension_numbers<[1], [0], [0], [1], [0, 0, 1, 1], [], []>} : vector<28x16xf32>, vector<16x112xf32>, vector<28x112xf32> -> vector<28x112xf32>
    %81 = arith.negf %80 : vector<28x112xf32>
    %82 = math.exp %81 : vector<28x112xf32>
    %cst_86 = arith.constant 1.000000e+00 : f32
    %83 = vector.broadcast %cst_86 : f32 to vector<28x112xf32>
    %84 = arith.addf %83, %82 : vector<28x112xf32>
    %85 = arith.divf %83, %84 : vector<28x112xf32>
    %cst_87 = arith.constant 1.000000e+00 : f32
    %86 = vector.broadcast %cst_87 : f32 to vector<28x112xf32>
    %87 = arith.addf %86, %85 : vector<28x112xf32>
    %88 = arith.mulf %1, %87 : vector<28x112xf32>
    %89 = vector.shape_cast %88 : vector<28x112xf32> to vector<1x28x112xf32>
    %c0_88 = arith.constant 0 : index
    %c0_89 = arith.constant 0 : index
    %c0_90 = arith.constant 0 : index
    %90 = vector.load %arg13[%c0_88, %c0_89, %c0_90] : memref<1x28x112xf32, #tpu.memory_space<vmem>>, vector<1x28x112xf32>
    tpu.vector_store %arg13[%c0_88, %c0_89, %c0_90], %89 {strides = array<i32>} : memref<1x28x112xf32, #tpu.memory_space<vmem>>, vector<1x28x112xf32>,
    return
  }
  func.func @transform_0(%arg0: i32) -> (i32, i32, i32) {
    %c0_i32 = arith.constant 0 : i32
    %c0_i32_0 = arith.constant 0 : i32
    %c0_i32_1 = arith.constant 0 : i32
    return %arg0, %c0_i32, %c0_i32_0 : i32, i32, i32
  }
  func.func @transform_1(%arg0: i32) -> (i32, i32, i32) {
    %c0_i32 = arith.constant 0 : i32
    %c0_i32_0 = arith.constant 0 : i32
    %c0_i32_1 = arith.constant 0 : i32
    %c0_i32_2 = arith.constant 0 : i32
    return %c0_i32, %c0_i32_0, %c0_i32_1 : i32, i32, i32
  }
  func.func @transform_2(%arg0: i32) -> (i32, i32, i32) {
    %c0_i32 = arith.constant 0 : i32
    %c0_i32_0 = arith.constant 0 : i32
    %c0_i32_1 = arith.constant 0 : i32
    %c0_i32_2 = arith.constant 0 : i32
    return %c0_i32, %c0_i32_0, %c0_i32_1 : i32, i32, i32
  }
  func.func @transform_3(%arg0: i32) -> (i32, i32) {
    %c0_i32 = arith.constant 0 : i32
    %c0_i32_0 = arith.constant 0 : i32
    %c0_i32_1 = arith.constant 0 : i32
    return %c0_i32, %c0_i32_0 : i32, i32
  }
  func.func @transform_4(%arg0: i32) -> (i32, i32, i32) {
    %c0_i32 = arith.constant 0 : i32
    %c0_i32_0 = arith.constant 0 : i32
    %c0_i32_1 = arith.constant 0 : i32
    %c0_i32_2 = arith.constant 0 : i32
    return %c0_i32, %c0_i32_0, %c0_i32_1 : i32, i32, i32
  }
  func.func @transform_5(%arg0: i32) -> (i32, i32, i32) {
    %c0_i32 = arith.constant 0 : i32
    %c0_i32_0 = arith.constant 0 : i32
    %c0_i32_1 = arith.constant 0 : i32
    %c0_i32_2 = arith.constant 0 : i32
    return %c0_i32, %c0_i32_0, %c0_i32_1 : i32, i32, i32
  }
  func.func @transform_6(%arg0: i32) -> (i32, i32) {
    %c0_i32 = arith.constant 0 : i32
    %c0_i32_0 = arith.constant 0 : i32
    %c0_i32_1 = arith.constant 0 : i32
    return %c0_i32, %c0_i32_0 : i32, i32
  }
  func.func @transform_7(%arg0: i32) -> (i32, i32, i32) {
    %c0_i32 = arith.constant 0 : i32
    %c0_i32_0 = arith.constant 0 : i32
    %c0_i32_1 = arith.constant 0 : i32
    %c0_i32_2 = arith.constant 0 : i32
    return %c0_i32, %c0_i32_0, %c0_i32_1 : i32, i32, i32
  }
  func.func @transform_8(%arg0: i32) -> (i32, i32, i32) {
    %c0_i32 = arith.constant 0 : i32
    %c0_i32_0 = arith.constant 0 : i32
    %c0_i32_1 = arith.constant 0 : i32
    %c0_i32_2 = arith.constant 0 : i32
    return %c0_i32, %c0_i32_0, %c0_i32_1 : i32, i32, i32
  }
  func.func @transform_9(%arg0: i32) -> (i32, i32) {
    %c0_i32 = arith.constant 0 : i32
    %c0_i32_0 = arith.constant 0 : i32
    %c0_i32_1 = arith.constant 0 : i32
    return %c0_i32, %c0_i32_0 : i32, i32
  }
  func.func @transform_10(%arg0: i32) -> (i32, i32) {
    %c0_i32 = arith.constant 0 : i32
    %c0_i32_0 = arith.constant 0 : i32
    %c0_i32_1 = arith.constant 0 : i32
    return %c0_i32, %c0_i32_0 : i32, i32
  }
  func.func @transform_11(%arg0: i32) -> (i32, i32) {
    %c0_i32 = arith.constant 0 : i32
    %c0_i32_0 = arith.constant 0 : i32
    %c0_i32_1 = arith.constant 0 : i32
    return %c0_i32, %c0_i32_0 : i32, i32
  }
  func.func @transform_12(%arg0: i32) -> (i32, i32, i32) {
    %c0_i32 = arith.constant 0 : i32
    %c0_i32_0 = arith.constant 0 : i32
    %c0_i32_1 = arith.constant 0 : i32
    return %arg0, %c0_i32, %c0_i32_0 : i32, i32, i32
  }
}

</mosaic_0001>

<bundles_post_ra>
// kernel: tpu_custom_call.1
= control target key start
LH: loop header
LB: loop body
LE: loop exit
PB: predicated region body
PF: predicated region fallthrough
CT: control target
= control target key end

     0   :  { %s2854_s21 = smov 0   ;;  %s3312_s0 = inlined_call_operand.vmem [shape: f32[2,28,112], index: 0, kind: input, shape index: {}]   ;;  %s3313_s1 = inlined_call_operand.vmem [shape: f32[3,14,28], index: 1, kind: input, shape index: {}]   ;;  %s3314_s2 = inlined_call_operand.vmem [shape: f32[3,112,56], index: 2, kind: input, shape index: {}]   ;;  %s3315_s3 = inlined_call_operand.vmem [shape: f32[1,56], index: 3, kind: input, shape index: {}]   ;;  %s3316_s4 = inlined_call_operand.vmem [shape: f32[3,7,14], index: 4, kind: input, shape index: {}]   ;;  %s3317_s5 = inlined_call_operand.vmem [shape: f32[3,56,28], index: 5, kind: input, shape index: {}]   ;;  %s3318_s6 = inlined_call_operand.vmem [shape: f32[1,28], index: 6, kind: input, shape index: {}]   ;;  %s3319_s7 = inlined_call_operand.vmem [shape: f32[3,4,7], index: 7, kind: input, shape index: {}]   ;;  %s3320_s8 = inlined_call_operand.vmem [shape: f32[3,28,16], index: 8, kind: input, shape index: {}]   ;;  %s3321_s9 = inlined_call_operand.vmem [shape: f32[1,16], index: 9, kind: input, shape index: {}]   ;;  %s3322_s10 = inlined_call_operand.vmem [shape: f32[28,4], index: 10, kind: input, shape index: {}]   ;;  %s3323_s11 = inlined_call_operand.vmem [shape: f32[16,112], index: 11, kind: input, shape index: {}]   ;;  %s3324_s12 = inlined_call_operand.vmem [shape: f32[2,28,112], index: 12, kind: output, shape index: {}]  }
   0x1 LB: > { %s2235_s22 = sadd.s32 4294967295, %s2785_s21   ;;  %p2239_p0 = scmp.ge.s32.totalorder %s2785_s21, 1  ;;  %s2785_s21 = sphi %s2854_s21, %s22_s21  }
   0x2   : > { %p362_p1 = scmp.lt.s32.totalorder %s2785_s21, 3 }
   0x4   : > { %p363_p2 = pnand %p2239_p0, %p362_p1 }
   0x5   : > { %p404_p3 = scmp.lt.s32.totalorder (!%p363_p2), %s2235_s22, 1 }
   0x6   : > { %366 = sbr.rel (%p363_p2) target bundleno = 2242 (0x8c2), region = 68 }
   0xb   : > { %v418_v0 = vld [vmem:[%s3313_s1] sm:$0xff]  ;;  %vm420_vm0 = vcmask 228352   ;;  %v2247_v1 = vld [vmem:[%s3313_s1 + $0x10] sm:$0xff]  ;;  %s3326_s22 = smov (!%p404_p3, %s2235_s22), 1  ;;  %vm427_vm1 = vcmask 1043456   ;;  %v2265_v8 = vld [vmem:[%s3314_s2 + $0xd8] sm:$0xff] }
   0xc   : > { %2497 = vmatprep.mubr.msk.f32.mxu0 %vm420_vm0, %v418_v0  ;;  %2508 = vmatprep.mubr.msk.f32.mxu1 %vm420_vm0, %v2247_v1  ;;  %s2356_s27 = sshll.u32 %s3326_s22, 5  ;;  %v419_v6 = vld [vmem:[%s3313_s1 + $0x8] sm:$0x3f]  ;;  %v2248_v7 = vld [vmem:[%s3313_s1 + $0x18] sm:$0x3f]  ;;  %v2264_v10 = vld [vmem:[%s3314_s2 + $0xd0] sm:$0xff] }
   0xd   : > { %s408_s30 = scalar_lea.vmem %s3312_s0, %s2356_s27  ;;  %v519_v9 = vld [vmem:[%s3314_s2 + $0x68] sm:$0xff]  ;;  %v518_v11 = vld [vmem:[%s3314_s2 + $0x60] sm:$0xff]  ;;  %v517_v13 = vld [vmem:[%s3314_s2 + $0x58] sm:$0xff]  ;;  %vm619_vm2 = vcmask 916480   ;;  %v2787_v60 = vmov 0.0   ;;  %vm2788_vm3 = vmmov 0   ;;  %s413_s25 = scalar_lea.vmem %s3324_s12, %s2356_s27 }
   0xe   : > { %v2878_v2 = vld [vmem:[%s408_s30 + $0x18] sm:$0xf]  ;;  %v2880_v3 = vld [vmem:[%s408_s30 + $0x10] sm:$0xff]  ;;  %v2890_v4 = vld [vmem:[%s408_s30 + $0x8] sm:$0xff]  ;;  %vm980_vm4 = vcmask 1045504   ;;  %vm976_vm5 = vcmask 113664  }
   0xf   : > { %2489 = vmatprep.subr.msk.mxu0 %vm427_vm1, %v2878_v2  ;;  %2500 = vmatprep.subr.msk.mxu1 %vm427_vm1, %v2878_v2  ;;  %v2896_v5 = vld [vmem:[%s408_s30] sm:$0xff]  ;;  %v2263_v12 = vld [vmem:[%s3314_s2 + $0xc8] sm:$0xff]  ;;  %v516_v15 = vld [vmem:[%s3314_s2 + $0x50] sm:$0xff]  ;;  %vm1144_vm6 = vcmask 457728   ;;  %vm1462_vm7 = vcmask 1046528   ;;  %vm1458_vm8 = vcmask 56320  }
  0x10   : > { %2490 = vmatpush3.msk.msra.mxu0 %vm427_vm1, %v2878_v2  ;;  %2501 = vmatpush3.msk.msra.mxu1 %vm427_vm1, %v2878_v2  ;;  %v2262_v14 = vld [vmem:[%s3314_s2 + $0xc0] sm:$0xff]  ;;  %v2261_v16 = vld [vmem:[%s3314_s2 + $0xb8] sm:$0xff]  ;;  %v515_v17 = vld [vmem:[%s3314_s2 + $0x48] sm:$0xff]  ;;  %vm1942_vm9 = vcmask 31744   ;;  %vm2045_vm10 = vcmask 130048   ;;  %vm2178_vm11 = vcmask 912384  }
  0x11   : > { %2491 = vmatprep.subr.mxu0 %v2880_v3  ;;  %2502 = vmatprep.subr.mxu1 %v2880_v3  ;;  %v2260_v18 = vld [vmem:[%s3314_s2 + $0xb0] sm:$0xff]  ;;  %v514_v19 = vld [vmem:[%s3314_s2 + $0x40] sm:$0xff]  ;;  %v2259_v20 = vld [vmem:[%s3314_s2 + $0xa8] sm:$0xff] }
  0x12   : > { %2492 = vmatpush3.msra.mxu0 %v2880_v3  ;;  %2503 = vmatpush3.msra.mxu1 %v2880_v3  ;;  %v513_v21 = vld [vmem:[%s3314_s2 + $0x38] sm:$0xff]  ;;  %v2258_v22 = vld [vmem:[%s3314_s2 + $0xa0] sm:$0xff]  ;;  %v512_v23 = vld [vmem:[%s3314_s2 + $0x30] sm:$0xff] }
  0x13   : > { %2493 = vmatprep.subr.mxu0 %v2890_v4  ;;  %2504 = vmatprep.subr.mxu1 %v2890_v4  ;;  %v2257_v24 = vld [vmem:[%s3314_s2 + $0x98] sm:$0xff]  ;;  %v511_v25 = vld [vmem:[%s3314_s2 + $0x28] sm:$0xff]  ;;  %v2256_v26 = vld [vmem:[%s3314_s2 + $0x90] sm:$0xff] }
  0x14   : > { %2494 = vmatpush3.msra.mxu0 %v2890_v4  ;;  %2505 = vmatpush3.msra.mxu1 %v2890_v4  ;;  %v510_v27 = vld [vmem:[%s3314_s2 + $0x20] sm:$0xff]  ;;  %v2255_v28 = vld [vmem:[%s3314_s2 + $0x88] sm:$0xff]  ;;  %v509_v29 = vld [vmem:[%s3314_s2 + $0x18] sm:$0xff] }
  0x15   : > { %2495 = vmatprep.subr.mxu0 %v2896_v5  ;;  %2506 = vmatprep.subr.mxu1 %v2896_v5  ;;  %v2254_v30 = vld [vmem:[%s3314_s2 + $0x80] sm:$0xff]  ;;  %v508_v31 = vld [vmem:[%s3314_s2 + $0x10] sm:$0xff]  ;;  %v2253_v32 = vld [vmem:[%s3314_s2 + $0x78] sm:$0xff] }
  0x16   : > { %2496 = vmatpush3.msra.mxu0 %v2896_v5  ;;  %2507 = vmatpush3.msra.mxu1 %v2896_v5  ;;  %v507_v33 = vld [vmem:[%s3314_s2 + $0x8] sm:$0xff]  ;;  %v2252_v34 = vld [vmem:[%s3314_s2 + $0x70] sm:$0xff]  ;;  %v506_v35 = vld [vmem:[%s3314_s2] sm:$0xff] }
  0x17   : > { %2498 = vmatmul.mubr.msk.f32.vlgmr.msra.gmra.mxu0 %vm420_vm0, %v419_v6  ;;  %2509 = vmatmul.mubr.msk.f32.vlgmr.msra.gmra.mxu1 %vm420_vm0, %v2248_v7  ;;  %v2288_v36 = vld [vmem:[%s3314_s2 + $0x148] sm:$0xff]  ;;  %v2270_v41 = vld [vmem:[%s3313_s1 + $0x20] sm:$0xff]  ;;  %v2286_v43 = vld [vmem:[%s3314_s2 + $0x138] sm:$0xff] }
  0x18   : > { %2511 = vmatprep.subr.mxu0 %v2265_v8  ;;  %2542 = vmatprep.subr.mxu1 %v519_v9  ;;  %v2287_v42 = vld [vmem:[%s3314_s2 + $0x140] sm:$0xff]  ;;  %v2285_v44 = vld [vmem:[%s3314_s2 + $0x130] sm:$0xff]  ;;  %v2271_v45 = vld [vmem:[%s3313_s1 + $0x28] sm:$0x3f] }
  0x19   : > { %2512 = vmatpush3.msra.mxu0 %v2265_v8  ;;  %2543 = vmatpush3.msra.mxu1 %v519_v9  ;;  %v2284_v46 = vld [vmem:[%s3314_s2 + $0x128] sm:$0xff]  ;;  %v2283_v47 = vld [vmem:[%s3314_s2 + $0x120] sm:$0xff]  ;;  %v2282_v48 = vld [vmem:[%s3314_s2 + $0x118] sm:$0xff] }
  0x1a   : > { %2513 = vmatprep.subr.mxu0 %v2264_v10  ;;  %2544 = vmatprep.subr.mxu1 %v518_v11  ;;  %v2281_v49 = vld [vmem:[%s3314_s2 + $0x110] sm:$0xff]  ;;  %v2280_v50 = vld [vmem:[%s3314_s2 + $0x108] sm:$0xff]  ;;  %v2279_v51 = vld [vmem:[%s3314_s2 + $0x100] sm:$0xff] }
  0x1b   : > { %2514 = vmatpush3.msra.mxu0 %v2264_v10  ;;  %2545 = vmatpush3.msra.mxu1 %v518_v11  ;;  %v2278_v52 = vld [vmem:[%s3314_s2 + $0xf8] sm:$0xff]  ;;  %v2277_v53 = vld [vmem:[%s3314_s2 + $0xf0] sm:$0xff]  ;;  %v2276_v54 = vld [vmem:[%s3314_s2 + $0xe8] sm:$0xff] }
  0x1c   : > { %2515 = vmatprep.subr.mxu0 %v2263_v12  ;;  %2546 = vmatprep.subr.mxu1 %v517_v13  ;;  %v2275_v55 = vld [vmem:[%s3314_s2 + $0xe0] sm:$0xff]  ;;  %v1060_v61 = vld [vmem:[%s3317_s5 + $0x30] sm:$0xff]  ;;  %v1059_v62 = vld [vmem:[%s3317_s5 + $0x28] sm:$0xff] }
  0x1d   : > { %2516 = vmatpush3.msra.mxu0 %v2263_v12  ;;  %2547 = vmatpush3.msra.mxu1 %v517_v13  ;;  %v1058_v63 = vld [vmem:[%s3317_s5 + $0x20] sm:$0xff]  ;;  %v1057_v0 = vld [vmem:[%s3317_s5 + $0x18] sm:$0xff]  ;;  %v1056_v1 = vld [vmem:[%s3317_s5 + $0x10] sm:$0xff] }
  0x1e   : > { %2517 = vmatprep.subr.mxu0 %v2262_v14  ;;  %2548 = vmatprep.subr.mxu1 %v516_v15  ;;  %v1055_v6 = vld [vmem:[%s3317_s5 + $0x8] sm:$0xff]  ;;  %v2291_v11 = vld [vmem:[%s3315_s3] ss:$0 sm:$0xff] }
  0x1f   : > { %2518 = vmatpush3.msra.mxu0 %v2262_v14  ;;  %2549 = vmatpush3.msra.mxu1 %v516_v15 }
  0x20   : > { %2519 = vmatprep.subr.mxu0 %v2261_v16  ;;  %2550 = vmatprep.subr.mxu1 %v515_v17 }
  0x21   : > { %2520 = vmatpush3.msra.mxu0 %v2261_v16  ;;  %2551 = vmatpush3.msra.mxu1 %v515_v17 }
  0x22   : > { %2521 = vmatprep.subr.mxu0 %v2260_v18  ;;  %2552 = vmatprep.subr.mxu1 %v514_v19 }
  0x23   : > { %2522 = vmatpush3.msra.mxu0 %v2260_v18  ;;  %2553 = vmatpush3.msra.mxu1 %v514_v19 }
  0x24   : > { %2523 = vmatprep.subr.mxu0 %v2259_v20  ;;  %2554 = vmatprep.subr.mxu1 %v513_v21 }
  0x25   : > { %2524 = vmatpush3.msra.mxu0 %v2259_v20  ;;  %2555 = vmatpush3.msra.mxu1 %v513_v21  ;;  %v975_v20 = vld [vmem:[%s3316_s4] sm:$0x7f]  ;;  %v2294_v21 = vld [vmem:[%s3316_s4 + $0x8] sm:$0x7f] }
  0x26   : > { %2525 = vmatprep.subr.mxu0 %v2258_v22  ;;  %2556 = vmatprep.subr.mxu1 %v512_v23 }
  0x27   : > { %2526 = vmatpush3.msra.mxu0 %v2258_v22  ;;  %2557 = vmatpush3.msra.mxu1 %v512_v23  ;;  %v2303_v22 = vld [vmem:[%s3317_s5 + $0x68] sm:$0xff]  ;;  %v2302_v23 = vld [vmem:[%s3317_s5 + $0x60] sm:$0xff] }
  0x28   : > { %2527 = vmatprep.subr.mxu0 %v2257_v24  ;;  %2558 = vmatprep.subr.mxu1 %v511_v25 }
  0x29   : > { %2528 = vmatpush3.msra.mxu0 %v2257_v24  ;;  %2559 = vmatpush3.msra.mxu1 %v511_v25  ;;  %v2301_v24 = vld [vmem:[%s3317_s5 + $0x58] sm:$0xff]  ;;  %v2300_v25 = vld [vmem:[%s3317_s5 + $0x50] sm:$0xff] }
  0x2a   : > { %2529 = vmatprep.subr.mxu0 %v2256_v26  ;;  %2560 = vmatprep.subr.mxu1 %v510_v27 }
  0x2b   : > { %2530 = vmatpush3.msra.mxu0 %v2256_v26  ;;  %2561 = vmatpush3.msra.mxu1 %v510_v27  ;;  %v2299_v26 = vld [vmem:[%s3317_s5 + $0x48] sm:$0xff]  ;;  %v1054_v27 = vld [vmem:[%s3317_s5] sm:$0xff] }
  0x2c   : > { %2531 = vmatprep.subr.mxu0 %v2255_v28  ;;  %2562 = vmatprep.subr.mxu1 %v509_v29 }
  0x2d   : > { %2532 = vmatpush3.msra.mxu0 %v2255_v28  ;;  %2563 = vmatpush3.msra.mxu1 %v509_v29  ;;  %v2298_v28 = vld [vmem:[%s3317_s5 + $0x40] sm:$0xff]  ;;  %v2297_v29 = vld [vmem:[%s3317_s5 + $0x38] sm:$0xff] }
  0x2e   : > { %2533 = vmatprep.subr.mxu0 %v2254_v30  ;;  %2564 = vmatprep.subr.mxu1 %v508_v31 }
  0x2f   : > { %2534 = vmatpush3.msra.mxu0 %v2254_v30  ;;  %2565 = vmatpush3.msra.mxu1 %v508_v31 }
  0x30   : > { %2535 = vmatprep.subr.mxu0 %v2253_v32  ;;  %2566 = vmatprep.subr.mxu1 %v507_v33 }
  0x31   : > { %2536 = vmatpush3.msra.mxu0 %v2253_v32  ;;  %2567 = vmatpush3.msra.mxu1 %v507_v33 }
  0x32   : > { %2537 = vmatprep.subr.mxu0 %v2252_v34  ;;  %2568 = vmatprep.subr.mxu1 %v506_v35 }
  0x33   : > { %2538 = vmatpush3.msra.mxu0 %v2252_v34  ;;  %2569 = vmatpush3.msra.mxu1 %v506_v35  ;;  %v2306_v34 = vld [vmem:[%s3316_s4 + $0x10] sm:$0x7f]  ;;  %v2315_v35 = vld [vmem:[%s3317_s5 + $0xa0] sm:$0xff] }
  0x34   : > { %2573 = vmatprep.subr.msk.mxu0 %vm427_vm1, %v2878_v2  ;;  %2584 = vmatprep.subr.mxu1 %v2288_v36 }
  0xd7   : > { %v2499_v37 = vpop.f32.mrf.mxu0  ;;  %v2510_v38 = vpop.f32.mrf.mxu1 }
  0xd9   : > { %v497_v39 = vpop.f32.mrf.mxu0  ;;  %v595_v40 = vpop.f32.mrf.mxu1 }
  0xda   : > { %2539 = vmatprep.mubr.msk.f32.mxu0 %vm619_vm2, %v595_v40  ;;  %2570 = vmatprep.mubr.msk.f32.mxu1 %vm619_vm2, %v497_v39  ;;  %v2311_v39 = vld [vmem:[%s3317_s5 + $0x80] sm:$0xff]  ;;  %v2310_v40 = vld [vmem:[%s3317_s5 + $0x78] sm:$0xff] }
  0xdb   : > { %2540 = vmatmul.mubr.msk.f32.vlgmr.msra.gmra.mxu0 %vm619_vm2, %v2510_v38  ;;  %2571 = vmatmul.mubr.msk.f32.vlgmr.msra.gmra.mxu1 %vm619_vm2, %v2499_v37  ;;  %v2313_v37 = vld [vmem:[%s3317_s5 + $0x90] sm:$0xff]  ;;  %v2312_v38 = vld [vmem:[%s3317_s5 + $0x88] sm:$0xff] }
  0xdc   : > { %2574 = vmatpush3.msk.msra.mxu0 %vm427_vm1, %v2878_v2  ;;  %2581 = vmatprep.mubr.msk.f32.mxu0 %vm420_vm0, %v2270_v41  ;;  %v2309_v41 = vld [vmem:[%s3317_s5 + $0x70] sm:$0xff] }
  0xdd   : > { %2575 = vmatprep.subr.mxu0 %v2880_v3  ;;  %2585 = vmatpush3.msra.mxu1 %v2288_v36  ;;  %v2314_v36 = vld [vmem:[%s3317_s5 + $0x98] sm:$0xff] }
  0xde   : > { %2576 = vmatpush3.msra.mxu0 %v2880_v3  ;;  %2586 = vmatprep.subr.mxu1 %v2287_v42 }
  0xdf   : > { %2577 = vmatprep.subr.mxu0 %v2890_v4  ;;  %2587 = vmatpush3.msra.mxu1 %v2287_v42 }
  0xe0   : > { %2578 = vmatpush3.msra.mxu0 %v2890_v4  ;;  %2588 = vmatprep.subr.mxu1 %v2286_v43 }
  0xe1   : > { %2579 = vmatprep.subr.mxu0 %v2896_v5  ;;  %2589 = vmatpush3.msra.mxu1 %v2286_v43 }
  0xe2   : > { %2580 = vmatpush3.msra.mxu0 %v2896_v5  ;;  %2590 = vmatprep.subr.mxu1 %v2285_v44 }
  0xe3   : > { %2582 = vmatmul.mubr.msk.f32.vlgmr.msra.gmra.mxu0 %vm420_vm0, %v2271_v45  ;;  %2591 = vmatpush3.msra.mxu1 %v2285_v44 }
  0xe4   : > { %2592 = vmatprep.subr.mxu1 %v2284_v46  ;;  %2615 = vmatprep.subr.mxu0 %v2787_v60 }
  0xe5   : > { %2593 = vmatpush3.msra.mxu1 %v2284_v46  ;;  %2619 = vmatprep.mubr.msk.f32.mxu0 %vm2788_vm3, %v2787_v60 }
  0xe6   : > { %2594 = vmatprep.subr.mxu1 %v2283_v47 }
  0xe7   : > { %2595 = vmatpush3.msra.mxu1 %v2283_v47 }
  0xe8   : > { %2596 = vmatprep.subr.mxu1 %v2282_v48 }
  0xe9   : > { %2597 = vmatpush3.msra.mxu1 %v2282_v48 }
  0xea   : > { %2598 = vmatprep.subr.mxu1 %v2281_v49 }
  0xeb   : > { %2599 = vmatpush3.msra.mxu1 %v2281_v49 }
  0xec   : > { %2600 = vmatprep.subr.mxu1 %v2280_v50 }
  0xed   : > { %2601 = vmatpush3.msra.mxu1 %v2280_v50  ;;  %v2317_v50 = vld [vmem:[%s3318_s6] ss:$0 sm:$0xff] }
  0xee   : > { %2602 = vmatprep.subr.mxu1 %v2279_v51 }
  0xef   : > { %2603 = vmatpush3.msra.mxu1 %v2279_v51 }
  0xf0   : > { %2604 = vmatprep.subr.mxu1 %v2278_v52 }
  0xf1   : > { %2605 = vmatpush3.msra.mxu1 %v2278_v52 }
  0xf2   : > { %2606 = vmatprep.subr.mxu1 %v2277_v53 }
  0xf3   : > { %2607 = vmatpush3.msra.mxu1 %v2277_v53 }
  0xf4   : > { %2608 = vmatprep.subr.mxu1 %v2276_v54 }
  0xf5   : > { %2609 = vmatpush3.msra.mxu1 %v2276_v54 }
  0xf6   : > { %2610 = vmatprep.subr.mxu1 %v2275_v55 }
  0xf7   : > { %2611 = vmatpush3.msra.mxu1 %v2275_v55  ;;  %v1457_v55 = vld [vmem:[%s3319_s7] sm:$0xf] }
  0xf8   : > { %2646 = vmatprep.subr.mxu1 %v2787_v60 }
 0x19b   : > { %v2541_v56 = vpop.f32.mrf.mxu0  ;;  %v2572_v7 = vpop.f32.mrf.mxu1 }
 0x19c   : > { %v779_v9 = vadd.f32 %v2572_v7, %v2541_v56  ;;  %v2320_v56 = vld [vmem:[%s3319_s7 + $0x4] sm:$0xf] }
 0x19d   : > { %v692_v57 = vpop.f32.mrf.mxu0  ;;  %v773_v8 = vpop.f32.mrf.mxu1 }
 0x19e   : > { %v774_v12 = vadd.f32 %v773_v8, %v692_v57  ;;  %v2326_v57 = vld [vmem:[%s3320_s8 + $0x38] sm:$0xf] }
 0x19f   : > { %v2337_v8 = vld [vmem:[%s3320_s8 + $0x58] sm:$0xf] }
 0x1a3   : > { %v2583_v58 = vpop.f32.mrf.mxu0 }
 0x1a5   : > { %v857_v59 = vpop.f32.mrf.mxu0 }
 0x1a6   : > { %2612 = vmatprep.mubr.msk.f32.mxu1 %vm619_vm2, %v857_v59  ;;  %v2325_v59 = vld [vmem:[%s3320_s8 + $0x30] sm:$0xff] }
 0x1a7   : > { %2613 = vmatmul.mubr.msk.f32.vlgmr.msra.gmra.mxu1 %vm619_vm2, %v2583_v58  ;;  %v1539_v58 = vld [vmem:[%s3320_s8 + $0x18] sm:$0xf] }
 0x1a8   : > { %2660 = vmatprep.mubr.msk.f32.mxu1 %vm2788_vm3, %v2787_v60  ;;  %2647 = vmatpush3.msra.mxu1 %v1060_v61  ;;  %v1538_v61 = vld [vmem:[%s3320_s8 + $0x10] sm:$0xff] }
 0x1a9   : > { %2648 = vmatprep.subr.mxu1 %v2787_v60 }
 0x1aa   : > { %2649 = vmatpush3.msra.mxu1 %v1059_v62  ;;  %v2324_v62 = vld [vmem:[%s3320_s8 + $0x28] sm:$0xff] }
 0x1ab   : > { %2650 = vmatprep.subr.mxu1 %v2787_v60 }
 0x1ac   : > { %2651 = vmatpush3.msra.mxu1 %v1058_v63  ;;  %v1537_v63 = vld [vmem:[%s3320_s8 + $0x8] sm:$0xff] }
 0x1ad   : > { %2652 = vmatprep.subr.mxu1 %v2787_v60 }
 0x1ae   : > { %2653 = vmatpush3.msra.mxu1 %v1057_v0  ;;  %v2323_v0 = vld [vmem:[%s3320_s8 + $0x20] sm:$0xff] }
 0x1af   : > { %2654 = vmatprep.subr.mxu1 %v2787_v60 }
 0x1b0   : > { %2655 = vmatpush3.msra.mxu1 %v1056_v1  ;;  %v1536_v1 = vld [vmem:[%s3320_s8] sm:$0xff] }
 0x1b1   : > { %2656 = vmatprep.subr.mxu1 %v2787_v60 }
 0x1b2   : > { %2657 = vmatpush3.msra.mxu1 %v1055_v6 }
 0x1b3   : > { %2658 = vmatprep.subr.mxu1 %v2787_v60 }
 0x1b4   : > { %2659 = vmatpush3.msra.mxu1 %v1054_v27 }
 0x1b5   : > { %2692 = vmatprep.subr.mxu1 %v2787_v60 }
 0x267   : > { %v2614_v10 = vpop.f32.mrf.mxu1 }
 0x268   : > { %v963_v13 = vadd.f32 %v2614_v10, %v779_v9  ;;  %v2331_v10 = vld [vmem:[%s3319_s7 + $0x8] sm:$0xf] }
 0x269   : > { %v953_v14 = vpop.f32.mrf.mxu1 }
 0x26a   : > { %v972_v15 = vadd.f32 %v2291_v11, %v963_v13  ;;  %v962_v16 = vadd.f32 %v953_v14, %v774_v12  ;;  %v2336_v12 = vld [vmem:[%s3320_s8 + $0x50] sm:$0xff]  ;;  %v2335_v13 = vld [vmem:[%s3320_s8 + $0x48] sm:$0xff]  ;;  %v2334_v14 = vld [vmem:[%s3320_s8 + $0x40] sm:$0xff] }
 0x26c   : > { %v974_v17 = vmax.f32 %v972_v15, 0.0  ;;  %v971_v18 = vadd.f32 %v2291_v11, %v962_v16 }
 0x26e   : > { %v973_v19 = vmax.f32 %v971_v18, 0.0  ;;  %2616 = vmatpush3.msk.msra.mxu0 %vm980_vm4, %v974_v17 }
 0x26f   : > { %2617 = vmatprep.subr.mxu0 %v2787_v60 }
 0x270   : > { %2618 = vmatpush3.msra.mxu0 %v973_v19 }
 0x271   : > { %2620 = vmatmul.mubr.msk.f32.vlgmr.msra.gmra.mxu0 %vm976_vm5, %v975_v20  ;;  %2622 = vmatprep.subr.mxu0 %v2787_v60 }
 0x272   : > { %2623 = vmatpush3.msk.msra.mxu0 %vm980_vm4, %v974_v17  ;;  %2626 = vmatprep.mubr.msk.f32.mxu0 %vm2788_vm3, %v2787_v60 }
 0x273   : > { %2624 = vmatprep.subr.mxu0 %v2787_v60 }
 0x274   : > { %2625 = vmatpush3.msra.mxu0 %v973_v19 }
 0x275   : > { %2627 = vmatmul.mubr.msk.f32.vlgmr.msra.gmra.mxu0 %vm976_vm5, %v2294_v21  ;;  %2629 = vmatprep.subr.mxu0 %v2787_v60 }
 0x276   : > { %2630 = vmatpush3.msra.mxu0 %v2303_v22  ;;  %2643 = vmatprep.mubr.msk.f32.mxu0 %vm2788_vm3, %v2787_v60  ;;  %v1938_v22 = vld [vmem:[%s3322_s10] sm:$0xff] }
 0x277   : > { %2631 = vmatprep.subr.mxu0 %v2787_v60 }
 0x278   : > { %2632 = vmatpush3.msra.mxu0 %v2302_v23  ;;  %v2340_v23 = vld [vmem:[%s3321_s9] ss:$0 sm:$0xff] }
 0x279   : > { %2633 = vmatprep.subr.mxu0 %v2787_v60 }
 0x27a   : > { %2634 = vmatpush3.msra.mxu0 %v2301_v24 }
 0x27b   : > { %2635 = vmatprep.subr.mxu0 %v2787_v60 }
 0x27c   : > { %2636 = vmatpush3.msra.mxu0 %v2300_v25 }
 0x27d   : > { %2637 = vmatprep.subr.mxu0 %v2787_v60 }
 0x27e   : > { %2638 = vmatpush3.msra.mxu0 %v2299_v26 }
 0x27f   : > { %2639 = vmatprep.subr.mxu0 %v2787_v60 }
 0x280   : > { %2640 = vmatpush3.msra.mxu0 %v2298_v28  ;;  %v1939_v28 = vld [vmem:[%s3322_s10 + $0x8] sm:$0xff] }
 0x281   : > { %2641 = vmatprep.subr.mxu0 %v2787_v60 }
 0x282   : > { %2642 = vmatpush3.msra.mxu0 %v2297_v29  ;;  %v1940_v29 = vld [vmem:[%s3322_s10 + $0x10] sm:$0xff] }
 0x283   : > { %2663 = vmatprep.subr.mxu0 %v2787_v60 }
 0x331   : > { %v1050_v30 = vpop.f32.mrf.mxu0 }
 0x332   : > { %2661 = vmatmul.mubr.msk.f32.vlgmr.msra.gmra.mxu1 %vm1144_vm6, %v1050_v30  ;;  %v1941_v30 = vld [vmem:[%s3322_s10 + $0x18] sm:$0xf] }
 0x333   : > { %v2621_v31 = vpop.f32.mrf.mxu0  ;;  %2694 = vmatprep.mubr.msk.f32.mxu1 %vm2788_vm3, %v2787_v60 }
 0x334   : > { %v2044_v31 = vld [vmem:[%s3323_s11 + $0x8] sm:$0xff] }
 0x335   : > { %v1132_v32 = vpop.f32.mrf.mxu0 }
 0x336   : > { %2644 = vmatmul.mubr.msk.f32.vlgmr.msra.gmra.mxu0 %vm1144_vm6, %v1132_v32  ;;  %v2043_v32 = vld [vmem:[%s3323_s11] sm:$0xff] }
 0x337   : > { %2664 = vmatpush3.msk.msra.mxu0 %vm980_vm4, %v974_v17  ;;  %v2628_v33 = vpop.f32.mrf.mxu0  ;;  %2667 = vmatprep.mubr.msk.f32.mxu0 %vm2788_vm3, %v2787_v60 }
 0x338   : > { %2665 = vmatprep.subr.mxu0 %v2787_v60 }
 0x339   : > { %2666 = vmatpush3.msra.mxu0 %v973_v19 }
 0x33a   : > { %2668 = vmatmul.mubr.msk.f32.vlgmr.msra.gmra.mxu0 %vm976_vm5, %v2306_v34  ;;  %2670 = vmatprep.subr.mxu0 %v2787_v60 }
 0x33b   : > { %2671 = vmatpush3.msra.mxu0 %v2315_v35  ;;  %2684 = vmatprep.mubr.msk.f32.mxu0 %vm2788_vm3, %v2787_v60 }
 0x33c   : > { %2672 = vmatprep.subr.mxu0 %v2787_v60 }
 0x33d   : > { %2673 = vmatpush3.msra.mxu0 %v2314_v36 }
 0x33e   : > { %2674 = vmatprep.subr.mxu0 %v2787_v60 }
 0x33f   : > { %2675 = vmatpush3.msra.mxu0 %v2313_v37 }
 0x340   : > { %2676 = vmatprep.subr.mxu0 %v2787_v60 }
 0x341   : > { %2677 = vmatpush3.msra.mxu0 %v2312_v38 }
 0x342   : > { %2678 = vmatprep.subr.mxu0 %v2787_v60 }
 0x343   : > { %2679 = vmatpush3.msra.mxu0 %v2311_v39 }
 0x344   : > { %2680 = vmatprep.subr.mxu0 %v2787_v60 }
 0x345   : > { %2681 = vmatpush3.msra.mxu0 %v2310_v40 }
 0x346   : > { %2682 = vmatprep.subr.mxu0 %v2787_v60 }
 0x347   : > { %2683 = vmatpush3.msra.mxu0 %v2309_v41 }
 0x348   : > { %2687 = vmatprep.subr.mxu0 %v2787_v60 }
 0x3f2   : > { %v1287_v42 = vpop.f32.mrf.mxu1 }
 0x3f4   : > { %v2662_v43 = vpop.f32.mrf.mxu1 }
 0x3f6   : > { %v1214_v44 = vpop.f32.mrf.mxu0 }
 0x3f7   : > { %v1288_v45 = vadd.f32 %v1287_v42, %v1214_v44 }
 0x3f8   : > { %v2645_v46 = vpop.f32.mrf.mxu0 }
 0x3fa   : > { %v1362_v47 = vpop.f32.mrf.mxu0 }
 0x3fb   : > { %2685 = vmatmul.mubr.msk.f32.vlgmr.msra.gmra.mxu0 %vm1144_vm6, %v1362_v47 }
 0x3fc   : > { %v2669_v48 = vpop.f32.mrf.mxu0  ;;  %2689 = vmatprep.mubr.msk.f32.mxu0 %vm2788_vm3, %v2787_v60 }
 0x4bb   : > { %v1443_v49 = vpop.f32.mrf.mxu0 }
 0x4bc   : > { %v1447_v51 = vadd.f32 %v1443_v49, %v1288_v45 }
 0x4bd   : > { %v2686_v52 = vpop.f32.mrf.mxu0 }
 0x4be   : > { %v1455_v53 = vadd.f32 %v2317_v50, %v1447_v51 }
 0x4c0   : > { %v1456_v54 = vmax.f32 %v1455_v53, 0.0 }
 0x4c2   : > { %2688 = vmatpush3.msk.msra.mxu0 %vm1462_vm7, %v1456_v54  ;;  %2693 = vmatpush3.msk.msra.mxu1 %vm1462_vm7, %v1456_v54 }
 0x4c3   : > { %2690 = vmatmul.mubr.msk.f32.vlgmr.msra.gmra.mxu0 %vm1458_vm8, %v1457_v55  ;;  %2695 = vmatmul.mubr.msk.f32.vlgmr.msra.gmra.mxu1 %vm1458_vm8, %v2320_v56 }
 0x4c4   : > { %2697 = vmatprep.subr.mxu0 %v2787_v60  ;;  %2708 = vmatprep.subr.mxu1 %v2787_v60 }
 0x4c5   : > { %2698 = vmatpush3.msk.msra.mxu0 %vm427_vm1, %v2326_v57  ;;  %2709 = vmatpush3.msk.msra.mxu1 %vm427_vm1, %v1539_v58 }
 0x4c6   : > { %2699 = vmatprep.subr.mxu0 %v2787_v60  ;;  %2710 = vmatprep.subr.mxu1 %v2787_v60 }
 0x4c7   : > { %2700 = vmatpush3.msra.mxu0 %v2325_v59  ;;  %2711 = vmatpush3.msra.mxu1 %v1538_v61 }
 0x4c8   : > { %2701 = vmatprep.subr.mxu0 %v2787_v60  ;;  %2712 = vmatprep.subr.mxu1 %v2787_v60 }
 0x4c9   : > { %2702 = vmatpush3.msra.mxu0 %v2324_v62  ;;  %2713 = vmatpush3.msra.mxu1 %v1537_v63 }
 0x4ca   : > { %2703 = vmatprep.subr.mxu0 %v2787_v60  ;;  %2714 = vmatprep.subr.mxu1 %v2787_v60 }
 0x4cb   : > { %2704 = vmatpush3.msra.mxu0 %v2323_v0  ;;  %2705 = vmatprep.mubr.msk.f32.mxu0 %vm2788_vm3, %v2787_v60 }
 0x4cc   : > { %2716 = vmatprep.mubr.msk.f32.mxu1 %vm2788_vm3, %v2787_v60  ;;  %2719 = vmatprep.subr.mxu0 %v2787_v60 }
 0x4cd   : > { %2715 = vmatpush3.msra.mxu1 %v1536_v1 }
 0x4ce   : > { %2724 = vmatprep.subr.mxu1 %v2787_v60 }
 0x583   : > { %v1532_v6 = vpop.f32.mrf.mxu0  ;;  %v1611_v7 = vpop.f32.mrf.mxu1 }
 0x584   : > { %2706 = vmatmul.mubr.msk.f32.vlgmr.msra.gmra.mxu0 %vm420_vm0, %v1611_v7  ;;  %2717 = vmatmul.mubr.msk.f32.vlgmr.msra.gmra.mxu1 %vm420_vm0, %v1532_v6 }
 0x585   : > { %2720 = vmatpush3.msk.msra.mxu0 %vm1462_vm7, %v1456_v54  ;;  %v2696_v9 = vpop.f32.mrf.mxu1  ;;  %2721 = vmatprep.mubr.msk.f32.mxu0 %vm2788_vm3, %v2787_v60  ;;  %v2691_v11 = vpop.f32.mrf.mxu0 }
 0x586   : > { %2725 = vmatpush3.msk.msra.mxu1 %vm427_vm1, %v2337_v8  ;;  %2732 = vmatprep.mubr.msk.f32.mxu1 %vm2788_vm3, %v2787_v60 }
 0x587   : > { %2726 = vmatprep.subr.mxu1 %v2787_v60 }
 0x588   : > { %2722 = vmatmul.mubr.msk.f32.vlgmr.msra.gmra.mxu0 %vm1458_vm8, %v2331_v10  ;;  %2727 = vmatpush3.msra.mxu1 %v2336_v12 }
 0x589   : > { %2728 = vmatprep.subr.mxu1 %v2787_v60  ;;  %2737 = vmatprep.mubr.msk.f32.mxu0 %vm1942_vm9, %v1938_v22 }
 0x58a   : > { %2729 = vmatpush3.msra.mxu1 %v2335_v13 }
 0x58b   : > { %2730 = vmatprep.subr.mxu1 %v2787_v60 }
 0x58c   : > { %2731 = vmatpush3.msra.mxu1 %v2334_v14 }
 0x58d   : > { %2743 = vmatprep.subr.mxu1 %v2044_v31 }
 0x644   : > { %v1692_v15 = vpop.f32.mrf.mxu0  ;;  %v1768_v16 = vpop.f32.mrf.mxu1 }
 0x645   : > { %v1769_v17 = vadd.f32 %v1768_v16, %v1692_v15 }
 0x646   : > { %v2707_v18 = vpop.f32.mrf.mxu0  ;;  %v2718_v19 = vpop.f32.mrf.mxu1 }
 0x648   : > { %v1843_v20 = vpop.f32.mrf.mxu0 }
 0x649   : > { %2733 = vmatmul.mubr.msk.f32.vlgmr.msra.gmra.mxu1 %vm420_vm0, %v1843_v20 }
 0x64a   : > { %v2723_v21 = vpop.f32.mrf.mxu0  ;;  %2744 = vmatpush3.msra.mxu1 %v2044_v31 }
 0x64b   : > { %2745 = vmatprep.subr.mxu1 %v2043_v32 }
 0x64c   : > { %2746 = vmatpush3.msra.mxu1 %v2043_v32 }
 0x709   : > { %v1924_v60 = vpop.f32.mrf.mxu1 }
 0x70a   : > { %v1928_v24 = vadd.f32 %v1924_v60, %v1769_v17 }
 0x70b   : > { %v2734_v25 = vpop.f32.mrf.mxu1 }
 0x70c   : > { %v1936_v26 = vadd.f32 %v2340_v23, %v1928_v24 }
 0x70e   : > { %v1937_v27 = vmax.f32 %v1936_v26, 0.0 }
 0x710   : > { %2735 = vmatprep.subr.msk.mxu0 %vm427_vm1, %v1937_v27 }
 0x711   : > { %2736 = vmatpush3.msk.msra.mxu0 %vm427_vm1, %v1937_v27 }
 0x712   : > { %2738 = vmatmul.mubr.msk.f32.vlgmr.msra.gmra.mxu0 %vm1942_vm9, %v1939_v28 }
 0x713   : > { %2740 = vmatprep.mubr.msk.f32.mxu0 %vm1942_vm9, %v1940_v29 }
 0x716   : > { %2741 = vmatmul.mubr.msk.f32.gmra.mxu0 %vm1942_vm9, %v1941_v30 }
 0x7d2   : > { %v2739_v33 = vpop.f32.mrf.mxu0 }
 0x7d4   : > { %v2024_v34 = vpop.f32.mrf.mxu0 }
 0x7d5   : > { %2747 = vmatprep.mubr.msk.f32.mxu1 %vm2045_vm10, %v2024_v34 }
 0x7d6   : > { %v2742_v35 = vpop.f32.mrf.mxu0  ;;  %2748 = vmatmul.mubr.msk.f32.vlgmr.msra.gmra.mxu1 %vm2045_vm10, %v2739_v33 }
 0x7d8   : > { %v2034_v36 = vpop.f32.mrf.mxu0 }
 0x7d9   : > { %2750 = vmatprep.mubr.msk.f32.mxu1 %vm2045_vm10, %v2034_v36 }
 0x7da   : > { %2751 = vmatmul.mubr.msk.f32.gmra.mxu1 %vm2045_vm10, %v2742_v35 }
 0x896   : > { %v2749_v37 = vpop.f32.mrf.mxu1 }
 0x897   : > { %v2351_v38 = vmul.f32 -1.442695, %v2749_v37 }
 0x898   : > { %v2124_v39 = vpop.f32.mrf.mxu1 }
 0x899   : > { %2763 = vpow2.f32 %v2351_v38  ;;  %v2350_v40 = vmul.f32 -1.442695, %v2124_v39 }
 0x89a   : > { %v2752_v41 = vpop.f32.mrf.mxu1 }
 0x89b   : > { %2765 = vpow2.f32 %v2350_v40  ;;  %v2353_v42 = vmul.f32 -1.442695, %v2752_v41 }
 0x89c   : > { %v2134_v43 = vpop.f32.mrf.mxu1 }
 0x89d   : > { %2767 = vpow2.f32 %v2353_v42  ;;  %v2352_v44 = vmul.f32 -1.442695, %v2134_v43 }
 0x89f   : > { %2769 = vpow2.f32 %v2352_v44 }
 0x8a6   : > { %v2764_v45 = vpop.eup %2763 }
 0x8a7   : > { %v2156_v46 = vadd.f32 1.0, %v2764_v45 }
 0x8a8   : > { %v2766_v47 = vpop.eup %2765 }
 0x8a9   : > { %2771 = vrcp.f32 %v2156_v46  ;;  %v2155_v48 = vadd.f32 1.0, %v2766_v47 }
 0x8aa   : > { %v2768_v49 = vpop.eup %2767 }
 0x8ab   : > { %2773 = vrcp.f32 %v2155_v48  ;;  %v2158_v50 = vadd.f32 1.0, %v2768_v49 }
 0x8ac   : > { %v2770_v51 = vpop.eup %2769 }
 0x8ad   : > { %2775 = vrcp.f32 %v2158_v50  ;;  %v2157_v52 = vadd.f32 1.0, %v2770_v51 }
 0x8af   : > { %2777 = vrcp.f32 %v2157_v52 }
 0x8b6   : > { %v2772_v53 = vpop.eup %2771 }
 0x8b7   : > { %v2168_v54 = vadd.f32 1.0, %v2772_v53 }
 0x8b8   : > { %v2774_v55 = vpop.eup %2773 }
 0x8b9   : > { %v2172_v56 = vmul.f32 %v2168_v54, %v2890_v4  ;;  %v2167_v57 = vadd.f32 1.0, %v2774_v55 }
 0x8ba   : > { %v2776_v58 = vpop.eup %2775 }
 0x8bb   : > { %2176 = vst.msk [vmem:[%s413_s25 + $0x8] sm:$0xff] %vm619_vm2, %v2172_v56  ;;  %v2171_v59 = vmul.f32 %v2167_v57, %v2896_v5  ;;  %v2170_v61 = vadd.f32 1.0, %v2776_v58 }
 0x8bc   : > { %v2778_v62 = vpop.eup %2777 }
 0x8bd   : > { %2175 = vst.msk [vmem:[%s413_s25] sm:$0xff] %vm619_vm2, %v2171_v59  ;;  %v2174_v63 = vmul.f32 %v2170_v61, %v2878_v2  ;;  %v2169_v0 = vadd.f32 1.0, %v2778_v62 }
 0x8bf   : > { %2179 = vst.msk [vmem:[%s413_s25 + $0x18] sm:$0xf] %vm2178_vm11, %v2174_v63  ;;  %v2173_v1 = vmul.f32 %v2169_v0, %v2880_v3 }
 0x8c1   : > { %2177 = vst.msk [vmem:[%s413_s25 + $0x10] sm:$0xff] %vm619_vm2, %v2173_v1 }
 0x8c2 PF: > { %s22_s21 = sadd.s32 1, %s2785_s21  }
 0x8c3   : > { %p19_p4 = scmp.ge.s32.totalorder %s22_s21, 4  }
 0x8c5   :  { %21 = sbr.rel (!%p19_p4) target bundleno = 1 (0x1), region = 110 }

</bundles_post_ra>
